<compile_context>
chip_gen: v6e
topology: v6e:2x2x1
jax: 0.10.0
libtpu: 0.0.40
codegen_flags: <defaults>
</compile_context>

<pallas_src>
import jax
import jax.numpy as jnp
from jax.experimental import pallas as pl
from jax.experimental.pallas import tpu as pltpu

EPS = 1e-5
H1, H2 = 256, 512


def _vmem_limit_bytes():
    # ~100 MiB on v5e/v6e (128 MiB physical VMEM), ~48 MiB on v7x (64 MiB physical).
    try:
        cap = int(pltpu.get_tpu_info().vmem_capacity_bytes)
    except Exception:
        return 48 * 1024 * 1024
    return int(min(cap - 16 * 1024 * 1024, 100 * 1024 * 1024))


def _pick_b_tile(B):
    # Largest tile that divides B; prefer multiples of 256 (fills the MXU M dim
    # on v6e/v7x). Every candidate is a multiple of 8 so blocks satisfy the
    # (8,128) sublane/lane rule; tiny/odd batches fall back to one full block.
    for t in (2048, 1024, 512, 256, 128, 64, 32, 16, 8):
        if B >= t and B % t == 0:
            return t
    return B


def _write_tile_stats(h, stats_ref):
    """Per-tile BN statistics, two-pass within the tile for numerical robustness.

    stats block is (1, 8, F): sublane 0 = sum(h), sublane 1 = sum((h - tile_mean)^2).
    Tiles are merged in the wrapper with Chan's parallel-variance formula.
    """
    n = h.shape[0]
    s = jnp.sum(h, axis=0, keepdims=True)            # [1, F]
    d = h - s * (1.0 / n)
    css = jnp.sum(d * d, axis=0, keepdims=True)      # [1, F]
    stats_ref[...] = jnp.zeros(stats_ref.shape, jnp.float32)
    stats_ref[:, 0:1, :] = s[None, :, :]
    stats_ref[:, 1:2, :] = css[None, :, :]


def _in_proj_kernel(x_ref, w_ref, h_ref, stats_ref):
    # Layer 1: x @ W1 (bf16 MXU operands, f32 accumulation) + per-tile BN1 stats.
    h = jnp.dot(x_ref[...].astype(jnp.bfloat16), w_ref[...],
                preferred_element_type=jnp.float32)
    h_ref[...] = h
    _write_tile_stats(h, stats_ref)


def _bn_relu_proj_kernel(h_in_ref, scale_ref, shift_ref, w_ref, h_ref, stats_ref):
    # Layer 2: fused BN1 normalize (2-op h*scale+shift) + ReLU + @ W2 + BN2 stats.
    a = jnp.maximum(h_in_ref[...] * scale_ref[...] + shift_ref[...], 0.0)
    h = jnp.dot(a.astype(jnp.bfloat16), w_ref[...],
                preferred_element_type=jnp.float32)
    h_ref[...] = h
    _write_tile_stats(h, stats_ref)


def _bn_relu_head_kernel(h_in_ref, scale_ref, shift_ref, w3_ref, y_ref):
    # Layer 3 (N=1): fused BN2 normalize + ReLU, then a lane-dense VPU multiply
    # + lane reduction (no lane-sparse MXU pass). Output is the compact (bt, 1)
    # pre-BN3 column -> 4 B/row HBM writeback.
    a = jnp.maximum(h_in_ref[...] * scale_ref[...] + shift_ref[...], 0.0)
    y_ref[...] = jnp.sum(a * w3_ref[...], axis=-1, keepdims=True)


def _merge_bn_stats(stats, n_tile, n_total, gamma, beta):
    """Merge per-tile (sum, centered ssq) into BN scale/shift (biased var, eps)."""
    s_t = stats[:, 0, :]                                   # (T, F) per-tile sums
    css_t = stats[:, 1, :]                                 # (T, F) per-tile centered ssq
    mean = jnp.sum(s_t, axis=0, keepdims=True) / n_total   # (1, F)
    m_t = s_t / n_tile
    var = (jnp.sum(css_t, axis=0, keepdims=True)
           + n_tile * jnp.sum((m_t - mean) ** 2, axis=0, keepdims=True)) / n_total
    scale = gamma * jax.lax.rsqrt(var + EPS)               # (1, F)
    shift = beta - mean * scale                            # (1, F)
    return scale, shift


def regressor_forward(x, params):
    """x: [B, in_c] float32.  Returns [B, 1] float32 (training-mode BatchNorm)."""
    B, in_c = x.shape
    bt = _pick_b_tile(B)
    T = B // bt
    cparams = pltpu.CompilerParams(
        dimension_semantics=("parallel",),       # batch tiles split across TCs (v7x)
        vmem_limit_bytes=_vmem_limit_bytes())

    w1, w2, w3 = params["w1"], params["w2"], params["w3"]

    # --- layer 1: h1 = x @ W1, per-tile BN1 stats -------------------------------
    h1, st1 = pl.pallas_call(
        _in_proj_kernel,
        grid=(T,),
        in_specs=[
            pl.BlockSpec((bt, in_c), lambda i: (i, 0)),
            pl.BlockSpec((in_c, H1), lambda i: (0, 0)),    # weights fetched once
        ],
        out_specs=[
            pl.BlockSpec((bt, H1), lambda i: (i, 0)),
            pl.BlockSpec((1, 8, H1), lambda i: (i, 0, 0)),
        ],
        out_shape=[
            jax.ShapeDtypeStruct((B, H1), jnp.float32),
            jax.ShapeDtypeStruct((T, 8, H1), jnp.float32),
        ],
        compiler_params=cparams,
    )(x, w1)
    scale1, shift1 = _merge_bn_stats(st1, bt, B, params["g1"], params["b1"])

    # --- layer 2: h2 = relu(bn1(h1)) @ W2, per-tile BN2 stats -------------------
    h2, st2 = pl.pallas_call(
        _bn_relu_proj_kernel,
        grid=(T,),
        in_specs=[
            pl.BlockSpec((bt, H1), lambda i: (i, 0)),
            pl.BlockSpec((1, H1), lambda i: (0, 0)),
            pl.BlockSpec((1, H1), lambda i: (0, 0)),
            pl.BlockSpec((H1, H2), lambda i: (0, 0)),      # weights fetched once
        ],
        out_specs=[
            pl.BlockSpec((bt, H2), lambda i: (i, 0)),
            pl.BlockSpec((1, 8, H2), lambda i: (i, 0, 0)),
        ],
        out_shape=[
            jax.ShapeDtypeStruct((B, H2), jnp.float32),
            jax.ShapeDtypeStruct((T, 8, H2), jnp.float32),
        ],
        compiler_params=cparams,
    )(h1, scale1, shift1, w2)
    scale2, shift2 = _merge_bn_stats(st2, bt, B, params["g2"], params["b2"])

    # --- layer 3: y_pre = relu(bn2(h2)) . w3  (N=1 head, VPU reduce) ------------
    y_pre = pl.pallas_call(
        _bn_relu_head_kernel,
        grid=(T,),
        in_specs=[
            pl.BlockSpec((bt, H2), lambda i: (i, 0)),
            pl.BlockSpec((1, H2), lambda i: (0, 0)),
            pl.BlockSpec((1, H2), lambda i: (0, 0)),
            pl.BlockSpec((1, H2), lambda i: (0, 0)),
        ],
        out_specs=pl.BlockSpec((bt, 1), lambda i: (i, 0)),
        out_shape=jax.ShapeDtypeStruct((B, 1), jnp.float32),
        compiler_params=cparams,
    )(h2, scale2, shift2, w3)

    # --- BN(1) over [B, 1]: O(B) scalars, exact two-pass f32 in plain XLA -------
    m3 = jnp.mean(y_pre, axis=0, keepdims=True)
    v3 = jnp.mean((y_pre - m3) ** 2, axis=0, keepdims=True)
    return (y_pre - m3) * (params["g3"] * jax.lax.rsqrt(v3 + EPS)) + params["b3"]


def init_params(key, in_c):
    """PyTorch-default Linear init U(-1/sqrt(fan_in), 1/sqrt(fan_in)).
    w1/w2 stored transposed ([in_f, out_f]) and pre-cast to bf16 (MXU operands);
    w3 stored as an f32 [1, 512] row (VPU reduce); BN gamma=1 / beta=0 in f32."""
    k1, k2, k3 = jax.random.split(key, 3)

    def lin_w(k, fan_in, shape, dtype):
        bound = 1.0 / jnp.sqrt(float(fan_in))
        w = jax.random.uniform(k, shape, jnp.float32, minval=-bound, maxval=bound)
        return w.astype(dtype)

    return {
        "w1": lin_w(k1, in_c, (in_c, H1), jnp.bfloat16),
        "g1": jnp.ones((1, H1), jnp.float32),
        "b1": jnp.zeros((1, H1), jnp.float32),
        "w2": lin_w(k2, H1, (H1, H2), jnp.bfloat16),
        "g2": jnp.ones((1, H2), jnp.float32),
        "b2": jnp.zeros((1, H2), jnp.float32),
        "w3": lin_w(k3, H2, (1, H2), jnp.float32),
        "g3": jnp.ones((1, 1), jnp.float32),
        "b3": jnp.zeros((1, 1), jnp.float32),
    }


def reference_forward(x, p):
    """Pure-JAX f32 reference (two-pass BN stats), matching PyTorch semantics."""
    def bn(h, g, b):
        m = jnp.mean(h, axis=0, keepdims=True)
        v = jnp.mean((h - m) ** 2, axis=0, keepdims=True)
        return (h - m) / jnp.sqrt(v + EPS) * g + b

    h = jnp.maximum(bn(x @ p["w1"].astype(jnp.float32), p["g1"], p["b1"]), 0.0)
    h = jnp.maximum(bn(h @ p["w2"].astype(jnp.float32), p["g2"], p["b2"]), 0.0)
    return bn(h @ p["w3"].T, p["g3"], p["b3"])


if __name__ == "__main__":
    B, in_c = 16, 32
    key = jax.random.PRNGKey(0)
    kx, kp = jax.random.split(key)

    x = jax.random.normal(kx, (B, in_c), jnp.float32)
    params = init_params(kp, in_c)

    out = jax.jit(regressor_forward)(x, params)
    out = jax.block_until_ready(out)

    ref = reference_forward(x, params)
    assert out.shape == (B, 1), out.shape
    # Tolerance covers bf16 MXU operands / bf16 x cast (f32 accumulation & BN math).
    assert jnp.allclose(out, ref, rtol=2e-2, atol=2e-2), (out, ref)

    print("KERNEL_OK")
</pallas_src>

<mosaic_0001>
module attributes {stable_mosaic.version = 11 : i64} {
  func.func @_in_proj_kernel(%arg0: i32, %arg1: memref<16x32xf32, #tpu.memory_space<vmem>>, %arg2: memref<32x256xbf16, #tpu.memory_space<vmem>>, %arg3: memref<16x256xf32, #tpu.memory_space<vmem>>, %arg4: memref<1x8x256xf32, #tpu.memory_space<vmem>>) attributes {dimension_semantics = [#tpu.dimension_semantics<parallel>], iteration_bounds = array<i64: 1>, scalar_prefetch = 0 : i64, scratch_operands = 0 : i64, tpu.core_type = #tpu.core_type<tc>, window_params = [{transform_indices = @transform_0, window_bounds = array<i64: 16, 32>}, {pipeline_mode = #tpu.pipeline_mode<synchronous>, transform_indices = @transform_1, window_bounds = array<i64: 32, 256>}, {transform_indices = @transform_2, window_bounds = array<i64: 16, 256>}, {transform_indices = @transform_3, window_bounds = array<i64: 1, 8, 256>}]} {
    %c0 = arith.constant 0 : index
    %c0_0 = arith.constant 0 : index
    %0 = vector.load %arg1[%c0, %c0_0] : memref<16x32xf32, #tpu.memory_space<vmem>>, vector<16x32xf32>
    %1 = arith.truncf %0 : vector<16x32xf32> to vector<16x32xbf16>
    %c0_1 = arith.constant 0 : index
    %c0_2 = arith.constant 0 : index
    %2 = vector.load %arg2[%c0_1, %c0_2] : memref<32x256xbf16, #tpu.memory_space<vmem>>, vector<32x256xbf16>
    %cst = arith.constant dense<0.000000e+00> : vector<16x256xf32>
    %3 = tpu.matmul %1, %2, %cst {dimension_numbers = #tpu.dot_dimension_numbers<[1], [0], [0], [1], [0, 0, 1, 1], [], []>} : vector<16x32xbf16>, vector<32x256xbf16>, vector<16x256xf32> -> vector<16x256xf32>
    %c0_3 = arith.constant 0 : index
    %c0_4 = arith.constant 0 : index
    %4 = vector.load %arg3[%c0_3, %c0_4] : memref<16x256xf32, #tpu.memory_space<vmem>>, vector<16x256xf32>
    tpu.vector_store %arg3[%c0_3, %c0_4], %3 {strides = array<i32>} : memref<16x256xf32, #tpu.memory_space<vmem>>, vector<16x256xf32>,
    %cst_5 = arith.constant dense<0.000000e+00> : vector<256xf32>
    %5 = vector.multi_reduction <add>, %3, %cst_5 [0] : vector<16x256xf32> to vector<256xf32>
    %6 = vector.shape_cast %5 : vector<256xf32> to vector<1x256xf32>
    %cst_6 = arith.constant 6.250000e-02 : f32
    %7 = vector.broadcast %cst_6 : f32 to vector<1x256xf32>
    %8 = arith.mulf %6, %7 : vector<1x256xf32>
    %9 = vector.broadcast %8 : vector<1x256xf32> to vector<16x256xf32>
    %10 = arith.subf %3, %9 : vector<16x256xf32>
    %11 = arith.mulf %10, %10 : vector<16x256xf32>
    %cst_7 = arith.constant dense<0.000000e+00> : vector<256xf32>
    %12 = vector.multi_reduction <add>, %11, %cst_7 [0] : vector<16x256xf32> to vector<256xf32>
    %13 = vector.shape_cast %12 : vector<256xf32> to vector<1x256xf32>
    %cst_8 = arith.constant 0.000000e+00 : f32
    %14 = vector.broadcast %cst_8 : f32 to vector<1x8x256xf32>
    %c0_9 = arith.constant 0 : index
    %c0_10 = arith.constant 0 : index
    %c0_11 = arith.constant 0 : index
    %15 = vector.load %arg4[%c0_9, %c0_10, %c0_11] : memref<1x8x256xf32, #tpu.memory_space<vmem>>, vector<1x8x256xf32>
    tpu.vector_store %arg4[%c0_9, %c0_10, %c0_11], %14 {strides = array<i32>} : memref<1x8x256xf32, #tpu.memory_space<vmem>>, vector<1x8x256xf32>,
    %16 = vector.shape_cast %6 : vector<1x256xf32> to vector<1x1x256xf32>
    %c0_12 = arith.constant 0 : index
    %c0_13 = arith.constant 0 : index
    %c0_14 = arith.constant 0 : index
    %17 = vector.load %arg4[%c0_12, %c0_13, %c0_14] : memref<1x8x256xf32, #tpu.memory_space<vmem>>, vector<1x1x256xf32>
    tpu.vector_store %arg4[%c0_12, %c0_13, %c0_14], %16 {strides = array<i32>} : memref<1x8x256xf32, #tpu.memory_space<vmem>>, vector<1x1x256xf32>,
    %18 = vector.shape_cast %13 : vector<1x256xf32> to vector<1x1x256xf32>
    %c0_15 = arith.constant 0 : index
    %c1 = arith.constant 1 : index
    %c0_16 = arith.constant 0 : index
    %19 = vector.load %arg4[%c0_15, %c1, %c0_16] : memref<1x8x256xf32, #tpu.memory_space<vmem>>, vector<1x1x256xf32>
    tpu.vector_store %arg4[%c0_15, %c1, %c0_16], %18 {strides = array<i32>} : memref<1x8x256xf32, #tpu.memory_space<vmem>>, vector<1x1x256xf32>,
    return
  }
  func.func @transform_0(%arg0: i32) -> (i32, i32) {
    %c0_i32 = arith.constant 0 : i32
    %c0_i32_0 = arith.constant 0 : i32
    return %arg0, %c0_i32 : i32, i32
  }
  func.func @transform_1(%arg0: i32) -> (i32, i32) {
    %c0_i32 = arith.constant 0 : i32
    %c0_i32_0 = arith.constant 0 : i32
    %c0_i32_1 = arith.constant 0 : i32
    return %c0_i32, %c0_i32_0 : i32, i32
  }
  func.func @transform_2(%arg0: i32) -> (i32, i32) {
    %c0_i32 = arith.constant 0 : i32
    %c0_i32_0 = arith.constant 0 : i32
    return %arg0, %c0_i32 : i32, i32
  }
  func.func @transform_3(%arg0: i32) -> (i32, i32, i32) {
    %c0_i32 = arith.constant 0 : i32
    %c0_i32_0 = arith.constant 0 : i32
    %c0_i32_1 = arith.constant 0 : i32
    return %arg0, %c0_i32, %c0_i32_0 : i32, i32, i32
  }
}

module attributes {stable_mosaic.version = 11 : i64} {
  func.func @_bn_relu_proj_kernel(%arg0: i32, %arg1: memref<16x256xf32, #tpu.memory_space<vmem>>, %arg2: memref<1x256xf32, #tpu.memory_space<vmem>>, %arg3: memref<1x256xf32, #tpu.memory_space<vmem>>, %arg4: memref<256x512xbf16, #tpu.memory_space<vmem>>, %arg5: memref<16x512xf32, #tpu.memory_space<vmem>>, %arg6: memref<1x8x512xf32, #tpu.memory_space<vmem>>) attributes {dimension_semantics = [#tpu.dimension_semantics<parallel>], iteration_bounds = array<i64: 1>, scalar_prefetch = 0 : i64, scratch_operands = 0 : i64, tpu.core_type = #tpu.core_type<tc>, window_params = [{transform_indices = @transform_0, window_bounds = array<i64: 16, 256>}, {pipeline_mode = #tpu.pipeline_mode<synchronous>, transform_indices = @transform_1, window_bounds = array<i64: 1, 256>}, {pipeline_mode = #tpu.pipeline_mode<synchronous>, transform_indices = @transform_2, window_bounds = array<i64: 1, 256>}, {pipeline_mode = #tpu.pipeline_mode<synchronous>, transform_indices = @transform_3, window_bounds = array<i64: 256, 512>}, {transform_indices = @transform_4, window_bounds = array<i64: 16, 512>}, {transform_indices = @transform_5, window_bounds = array<i64: 1, 8, 512>}]} {
    %c0 = arith.constant 0 : index
    %c0_0 = arith.constant 0 : index
    %0 = vector.load %arg1[%c0, %c0_0] : memref<16x256xf32, #tpu.memory_space<vmem>>, vector<16x256xf32>
    %c0_1 = arith.constant 0 : index
    %c0_2 = arith.constant 0 : index
    %1 = vector.load %arg2[%c0_1, %c0_2] : memref<1x256xf32, #tpu.memory_space<vmem>>, vector<1x256xf32>
    %2 = vector.broadcast %1 : vector<1x256xf32> to vector<16x256xf32>
    %3 = arith.mulf %0, %2 : vector<16x256xf32>
    %c0_3 = arith.constant 0 : index
    %c0_4 = arith.constant 0 : index
    %4 = vector.load %arg3[%c0_3, %c0_4] : memref<1x256xf32, #tpu.memory_space<vmem>>, vector<1x256xf32>
    %5 = vector.broadcast %4 : vector<1x256xf32> to vector<16x256xf32>
    %6 = arith.addf %3, %5 : vector<16x256xf32>
    %cst = arith.constant 0.000000e+00 : f32
    %7 = vector.broadcast %cst : f32 to vector<16x256xf32>
    %8 = arith.maximumf %6, %7 : vector<16x256xf32>
    %9 = arith.truncf %8 : vector<16x256xf32> to vector<16x256xbf16>
    %c0_5 = arith.constant 0 : index
    %c0_6 = arith.constant 0 : index
    %10 = vector.load %arg4[%c0_5, %c0_6] : memref<256x512xbf16, #tpu.memory_space<vmem>>, vector<256x512xbf16>
    %cst_7 = arith.constant dense<0.000000e+00> : vector<16x512xf32>
    %11 = tpu.matmul %9, %10, %cst_7 {dimension_numbers = #tpu.dot_dimension_numbers<[1], [0], [0], [1], [0, 0, 1, 1], [], []>} : vector<16x256xbf16>, vector<256x512xbf16>, vector<16x512xf32> -> vector<16x512xf32>
    %c0_8 = arith.constant 0 : index
    %c0_9 = arith.constant 0 : index
    %12 = vector.load %arg5[%c0_8, %c0_9] : memref<16x512xf32, #tpu.memory_space<vmem>>, vector<16x512xf32>
    tpu.vector_store %arg5[%c0_8, %c0_9], %11 {strides = array<i32>} : memref<16x512xf32, #tpu.memory_space<vmem>>, vector<16x512xf32>,
    %cst_10 = arith.constant dense<0.000000e+00> : vector<512xf32>
    %13 = vector.multi_reduction <add>, %11, %cst_10 [0] : vector<16x512xf32> to vector<512xf32>
    %14 = vector.shape_cast %13 : vector<512xf32> to vector<1x512xf32>
    %cst_11 = arith.constant 6.250000e-02 : f32
    %15 = vector.broadcast %cst_11 : f32 to vector<1x512xf32>
    %16 = arith.mulf %14, %15 : vector<1x512xf32>
    %17 = vector.broadcast %16 : vector<1x512xf32> to vector<16x512xf32>
    %18 = arith.subf %11, %17 : vector<16x512xf32>
    %19 = arith.mulf %18, %18 : vector<16x512xf32>
    %cst_12 = arith.constant dense<0.000000e+00> : vector<512xf32>
    %20 = vector.multi_reduction <add>, %19, %cst_12 [0] : vector<16x512xf32> to vector<512xf32>
    %21 = vector.shape_cast %20 : vector<512xf32> to vector<1x512xf32>
    %cst_13 = arith.constant 0.000000e+00 : f32
    %22 = vector.broadcast %cst_13 : f32 to vector<1x8x512xf32>
    %c0_14 = arith.constant 0 : index
    %c0_15 = arith.constant 0 : index
    %c0_16 = arith.constant 0 : index
    %23 = vector.load %arg6[%c0_14, %c0_15, %c0_16] : memref<1x8x512xf32, #tpu.memory_space<vmem>>, vector<1x8x512xf32>
    tpu.vector_store %arg6[%c0_14, %c0_15, %c0_16], %22 {strides = array<i32>} : memref<1x8x512xf32, #tpu.memory_space<vmem>>, vector<1x8x512xf32>,
    %24 = vector.shape_cast %14 : vector<1x512xf32> to vector<1x1x512xf32>
    %c0_17 = arith.constant 0 : index
    %c0_18 = arith.constant 0 : index
    %c0_19 = arith.constant 0 : index
    %25 = vector.load %arg6[%c0_17, %c0_18, %c0_19] : memref<1x8x512xf32, #tpu.memory_space<vmem>>, vector<1x1x512xf32>
    tpu.vector_store %arg6[%c0_17, %c0_18, %c0_19], %24 {strides = array<i32>} : memref<1x8x512xf32, #tpu.memory_space<vmem>>, vector<1x1x512xf32>,
    %26 = vector.shape_cast %21 : vector<1x512xf32> to vector<1x1x512xf32>
    %c0_20 = arith.constant 0 : index
    %c1 = arith.constant 1 : index
    %c0_21 = arith.constant 0 : index
    %27 = vector.load %arg6[%c0_20, %c1, %c0_21] : memref<1x8x512xf32, #tpu.memory_space<vmem>>, vector<1x1x512xf32>
    tpu.vector_store %arg6[%c0_20, %c1, %c0_21], %26 {strides = array<i32>} : memref<1x8x512xf32, #tpu.memory_space<vmem>>, vector<1x1x512xf32>,
    return
  }
  func.func @transform_0(%arg0: i32) -> (i32, i32) {
    %c0_i32 = arith.constant 0 : i32
    %c0_i32_0 = arith.constant 0 : i32
    return %arg0, %c0_i32 : i32, i32
  }
  func.func @transform_1(%arg0: i32) -> (i32, i32) {
    %c0_i32 = arith.constant 0 : i32
    %c0_i32_0 = arith.constant 0 : i32
    %c0_i32_1 = arith.constant 0 : i32
    return %c0_i32, %c0_i32_0 : i32, i32
  }
  func.func @transform_2(%arg0: i32) -> (i32, i32) {
    %c0_i32 = arith.constant 0 : i32
    %c0_i32_0 = arith.constant 0 : i32
    %c0_i32_1 = arith.constant 0 : i32
    return %c0_i32, %c0_i32_0 : i32, i32
  }
  func.func @transform_3(%arg0: i32) -> (i32, i32) {
    %c0_i32 = arith.constant 0 : i32
    %c0_i32_0 = arith.constant 0 : i32
    %c0_i32_1 = arith.constant 0 : i32
    return %c0_i32, %c0_i32_0 : i32, i32
  }
  func.func @transform_4(%arg0: i32) -> (i32, i32) {
    %c0_i32 = arith.constant 0 : i32
    %c0_i32_0 = arith.constant 0 : i32
    return %arg0, %c0_i32 : i32, i32
  }
  func.func @transform_5(%arg0: i32) -> (i32, i32, i32) {
    %c0_i32 = arith.constant 0 : i32
    %c0_i32_0 = arith.constant 0 : i32
    %c0_i32_1 = arith.constant 0 : i32
    return %arg0, %c0_i32, %c0_i32_0 : i32, i32, i32
  }
}

module attributes {stable_mosaic.version = 11 : i64} {
  func.func @_bn_relu_head_kernel(%arg0: i32, %arg1: memref<16x512xf32, #tpu.memory_space<vmem>>, %arg2: memref<1x512xf32, #tpu.memory_space<vmem>>, %arg3: memref<1x512xf32, #tpu.memory_space<vmem>>, %arg4: memref<1x512xf32, #tpu.memory_space<vmem>>, %arg5: memref<16x1xf32, #tpu.memory_space<vmem>>) attributes {dimension_semantics = [#tpu.dimension_semantics<parallel>], iteration_bounds = array<i64: 1>, scalar_prefetch = 0 : i64, scratch_operands = 0 : i64, tpu.core_type = #tpu.core_type<tc>, window_params = [{transform_indices = @transform_0, window_bounds = array<i64: 16, 512>}, {pipeline_mode = #tpu.pipeline_mode<synchronous>, transform_indices = @transform_1, window_bounds = array<i64: 1, 512>}, {pipeline_mode = #tpu.pipeline_mode<synchronous>, transform_indices = @transform_2, window_bounds = array<i64: 1, 512>}, {pipeline_mode = #tpu.pipeline_mode<synchronous>, transform_indices = @transform_3, window_bounds = array<i64: 1, 512>}, {transform_indices = @transform_4, window_bounds = array<i64: 16, 1>}]} {
    %c0 = arith.constant 0 : index
    %c0_0 = arith.constant 0 : index
    %0 = vector.load %arg1[%c0, %c0_0] : memref<16x512xf32, #tpu.memory_space<vmem>>, vector<16x512xf32>
    %c0_1 = arith.constant 0 : index
    %c0_2 = arith.constant 0 : index
    %1 = vector.load %arg2[%c0_1, %c0_2] : memref<1x512xf32, #tpu.memory_space<vmem>>, vector<1x512xf32>
    %2 = vector.broadcast %1 : vector<1x512xf32> to vector<16x512xf32>
    %3 = arith.mulf %0, %2 : vector<16x512xf32>
    %c0_3 = arith.constant 0 : index
    %c0_4 = arith.constant 0 : index
    %4 = vector.load %arg3[%c0_3, %c0_4] : memref<1x512xf32, #tpu.memory_space<vmem>>, vector<1x512xf32>
    %5 = vector.broadcast %4 : vector<1x512xf32> to vector<16x512xf32>
    %6 = arith.addf %3, %5 : vector<16x512xf32>
    %cst = arith.constant 0.000000e+00 : f32
    %7 = vector.broadcast %cst : f32 to vector<16x512xf32>
    %8 = arith.maximumf %6, %7 : vector<16x512xf32>
    %c0_5 = arith.constant 0 : index
    %c0_6 = arith.constant 0 : index
    %9 = vector.load %arg4[%c0_5, %c0_6] : memref<1x512xf32, #tpu.memory_space<vmem>>, vector<1x512xf32>
    %10 = vector.broadcast %9 : vector<1x512xf32> to vector<16x512xf32>
    %11 = arith.mulf %8, %10 : vector<16x512xf32>
    %cst_7 = arith.constant dense<0.000000e+00> : vector<16xf32>
    %12 = vector.multi_reduction <add>, %11, %cst_7 [1] : vector<16x512xf32> to vector<16xf32>
    %13 = vector.shape_cast %12 : vector<16xf32> to vector<16x1xf32>
    %c0_8 = arith.constant 0 : index
    %c0_9 = arith.constant 0 : index
    %14 = vector.load %arg5[%c0_8, %c0_9] : memref<16x1xf32, #tpu.memory_space<vmem>>, vector<16x1xf32>
    tpu.vector_store %arg5[%c0_8, %c0_9], %13 {strides = array<i32>} : memref<16x1xf32, #tpu.memory_space<vmem>>, vector<16x1xf32>,
    return
  }
  func.func @transform_0(%arg0: i32) -> (i32, i32) {
    %c0_i32 = arith.constant 0 : i32
    %c0_i32_0 = arith.constant 0 : i32
    return %arg0, %c0_i32 : i32, i32
  }
  func.func @transform_1(%arg0: i32) -> (i32, i32) {
    %c0_i32 = arith.constant 0 : i32
    %c0_i32_0 = arith.constant 0 : i32
    %c0_i32_1 = arith.constant 0 : i32
    return %c0_i32, %c0_i32_0 : i32, i32
  }
  func.func @transform_2(%arg0: i32) -> (i32, i32) {
    %c0_i32 = arith.constant 0 : i32
    %c0_i32_0 = arith.constant 0 : i32
    %c0_i32_1 = arith.constant 0 : i32
    return %c0_i32, %c0_i32_0 : i32, i32
  }
  func.func @transform_3(%arg0: i32) -> (i32, i32) {
    %c0_i32 = arith.constant 0 : i32
    %c0_i32_0 = arith.constant 0 : i32
    %c0_i32_1 = arith.constant 0 : i32
    return %c0_i32, %c0_i32_0 : i32, i32
  }
  func.func @transform_4(%arg0: i32) -> (i32, i32) {
    %c0_i32 = arith.constant 0 : i32
    %c0_i32_0 = arith.constant 0 : i32
    return %arg0, %c0_i32 : i32, i32
  }
}

</mosaic_0001>

<bundles_post_ra>
// kernel: regressor_forward.3
= control target key start
LH: loop header
LB: loop body
LE: loop exit
PB: predicated region body
PF: predicated region fallthrough
CT: control target
= control target key end

     0   :  { %9 = vsyncpa [#allocation3], 0  ;;  %s343_s0 = inlined_call_operand.hbm [shape: f32[16,32], index: 0, kind: input, shape index: {}]   ;;  %s344_s1 = inlined_call_operand.hbm [shape: bf16[32,256], index: 1, kind: input, shape index: {}]   ;;  %s345_s2 = inlined_call_operand.vmem [shape: f32[16,256], index: 2, kind: output, shape index: {0}]   ;;  %s346_s3 = inlined_call_operand.vmem [shape: f32[1,8,256], index: 3, kind: output, shape index: {1}]  }
   0x1   :  { %10 = vsyncpa [#allocation5], 0  ;;  %s278_s12 = smov [#allocation2]  }
   0x2   :  { %s16_s13 = sshll.u32 %s278_s12, 4  ;;  %s17_s13 = int_to_ptr.vmem [resolvable:$true] %s16_s13 }
   0x3   :  { %s242_s14 = scalar_lea.vmem %s17_s13, 256  ;;  %p247_p1 = scmp.lt.s32.totalorder %s17_s13, %s17_s13 }
   0x4   :  { %p243_p0 = scmp.ne.s32.totalorder %s17_s13, %s242_s14  ;;  %p248_p2 = scmp.lt.s32.totalorder %s242_s14, %s242_s14 }
   0x6   :  { %p249_p3 = por %p248_p2, %p247_p1 }
   0x8   :  { %p250_p4 = pnand %p249_p3, %p243_p0 }
   0xa   :  { %253 = shalt.err (!%p250_p4)
}
   0xb   :  { %s279_s15 = smov 128   ;;  %s280_s16 = smov 8  }
   0xc   :  { %22 = dma.hbm_to_vmem [thread:$0]  %s343_s0, 256, %s17_s13, [#allocation3], %s279_s15, %s279_s15, %s280_s16  }
   0xd   :  { %s281_s19 = smov [#allocation4]  }
   0xe   :  { %s28_s20 = sshll.u32 %s281_s19, 4  ;;  %s29_s20 = int_to_ptr.vmem [resolvable:$true] %s28_s20 }
   0xf   :  { %s262_s21 = scalar_lea.vmem %s29_s20, 512  ;;  %p267_p6 = scmp.lt.s32.totalorder %s29_s20, %s29_s20 }
  0x10   :  { %p263_p5 = scmp.ne.s32.totalorder %s29_s20, %s262_s21  ;;  %p268_p7 = scmp.lt.s32.totalorder %s262_s21, %s262_s21 }
  0x12   :  { %p269_p8 = por %p268_p7, %p267_p6 }
  0x14   :  { %p270_p9 = pnand %p269_p8, %p263_p5 }
  0x16   :  { %273 = shalt.err (!%p270_p9)
}
  0x17   :  { %34 = dma.hbm_to_vmem [thread:$0]  %s344_s1, 512, %s29_s20, [#allocation5], %s279_s15, %s279_s15, %s280_s16  }
  0x18   :  { %274 = dma.done.wait [#allocation3], 256  }
  0x19   :  { %275 = vsyncadd [#allocation3], 4294967040 }
  0x1a   :  { %276 = dma.done.wait [#allocation5], 512  }
  0x1b   :  { %277 = vsyncadd [#allocation5], 4294966784  ;;  %v282_v0 = vmov 0   ;;  %v228_v1 = vld [vmem:[#allocation4 + $0x14] ss:$8 sps:$4 sm:$0xff]   ;;  %vm69_vm0 = vcmask 261120   ;;  %v166_v22 = vlaneseq }
  0x1c   :  { %105 = vmatprep.mubr.bf16.mxu0 %v282_v0  ;;  %v230_v2 = vld [vmem:[#allocation4 + $0x10] ss:$8 sps:$4 sm:$0xff]   ;;  %85 = vmatprep.subr.bf16.mxu0 %v228_v1  ;;  %v231_v3 = vld [vmem:[#allocation4 + $0x4] ss:$8 sps:$4 sm:$0xff]   ;;  %v233_v4 = vld [vmem:[#allocation4] ss:$8 sps:$4 sm:$0xff]  }
  0x1d   :  { %86 = vmatpush1.bf16.msra.mxu0 %v230_v2  ;;  %v42_v5 = vld [vmem:[#allocation2] sm:$0xff]  ;;  %v43_v6 = vld [vmem:[#allocation2 + $0x8] sm:$0xff]  ;;  %v283_v8 = vmov 0.0   ;;  %v284_v20 = vmov 1966171168   ;;  %v167_v28 = vshrl.u32 %v166_v22, 7 }
  0x1e   :  { %87 = vmatprep.subr.bf16.mxu0 %v231_v3  ;;  %v44_v7 = vpack.c.bf16 %v43_v6, %v42_v5  ;;  %158 = vst [vmem:[%s346_s3] sm:$0xff] %v283_v8  ;;  %159 = vst [vmem:[%s346_s3 + $0x8] sm:$0xff] %v283_v8  ;;  %v164_v21 = vunpack.c.l.s4 %v284_v20  ;;  %vm329_vm1 = vcmp.lt.s32.totalorder %v166_v22, 256 }
  0x20   :  { %v165_v27 = vunpack.c.0.s8 %v164_v21 }
  0x21   :  { %88 = vmatpush1.bf16.msra.mxu0 %v233_v4 }
  0x22   :  { %v168_v33 = vsub.s32 %v165_v27, %v167_v28 }
  0x24   :  { %219 = vmatmul.mubr.msk.bf16.vlgmr.msra.gmra.mxu0 %vm69_vm0, %v44_v7 }
  0xe4   :  { %v107_v9 = vpop.f32.mrf.mxu0 }
  0xe5   :  { %116 = vst [vmem:[%s345_s2] sm:$0xff] %v107_v9 }
  0xe6   :  { %v109_v10 = vpop.f32.mrf.mxu0 }
  0xe7   :  { %117 = vst [vmem:[%s345_s2 + $0x8] sm:$0xff] %v109_v10 }
  0xe8   :  { %v111_v11 = vpop.f32.mrf.mxu0 }
  0xe9   :  { %118 = vst [vmem:[%s345_s2 + $0x10] sm:$0xff] %v111_v11  ;;  %v120_v12 = vadd.f32 %v111_v11, %v107_v9 }
  0xea   :  { %v113_v13 = vpop.f32.mrf.mxu0 }
  0xeb   :  { %v121_v14 = vrot.slane %v120_v12, 4  ;;  %119 = vst [vmem:[%s345_s2 + $0x18] sm:$0xff] %v113_v13  ;;  %v127_v15 = vadd.f32 %v113_v13, %v109_v10 }
  0xed   :  { %v122_v16 = vadd.f32 %v121_v14, %v120_v12  ;;  %v128_v17 = vrot.slane %v127_v15, 4 }
  0xef   :  { %v123_v18 = vrot.slane %v122_v16, 2  ;;  %v129_v19 = vadd.f32 %v128_v17, %v127_v15 }
  0xf1   :  { %v124_v23 = vadd.f32 %v123_v18, %v122_v16  ;;  %v130_v24 = vrot.slane %v129_v19, 2 }
  0xf3   :  { %v125_v25 = vrot.slane %v124_v23, 1  ;;  %v131_v26 = vadd.f32 %v130_v24, %v129_v19 }
  0xf5   :  { %v126_v29 = vadd.f32 %v125_v25, %v124_v23  ;;  %v132_v30 = vrot.slane %v131_v26, 1 }
  0xf7   :  { %v134_v31 = vmul.f32 0.0625, %v126_v29  ;;  %v133_v32 = vadd.f32 %v132_v30, %v131_v26 }
  0xf9   :  { %v136_v34 = vsub.f32 %v107_v9, %v134_v31  ;;  %v138_v35 = vsub.f32 %v111_v11, %v134_v31  ;;  %v135_v36 = vmul.f32 0.0625, %v133_v32  ;;  %v162_v37 = vcombine.low %v126_v29, %v133_v32 }
  0xfb   :  { %v140_v38 = vmul.f32 %v136_v34, %v136_v34  ;;  %v142_v39 = vmul.f32 %v138_v35, %v138_v35  ;;  %v137_v40 = vsub.f32 %v109_v10, %v135_v36  ;;  %v139_v41 = vsub.f32 %v113_v13, %v135_v36 }
  0xfc   :  { %v169_v42 = vrot.slane %v162_v37, %v168_v33 }
  0xfd   :  { %v144_v43 = vadd.f32 %v142_v39, %v140_v38  ;;  %v141_v44 = vmul.f32 %v137_v40, %v137_v40  ;;  %v143_v45 = vmul.f32 %v139_v41, %v139_v41 }
  0xfe   :  { %v176_v47 = vrot.slane %v169_v42, %v168_v33 }
  0xff   :  { %v145_v48 = vrot.slane %v144_v43, 4  ;;  %v151_v49 = vadd.f32 %v143_v45, %v141_v44 }
 0x100   :  { %182 = vst.msk [vmem:[%s346_s3] ss:$8 sm:$0x3] %vm329_vm1, %v176_v47 }
 0x101   :  { %v146_v50 = vadd.f32 %v145_v48, %v144_v43  ;;  %v152_v51 = vrot.slane %v151_v49, 4 }
 0x103   :  { %v147_v52 = vrot.slane %v146_v50, 2  ;;  %v153_v53 = vadd.f32 %v152_v51, %v151_v49 }
 0x105   :  { %v148_v54 = vadd.f32 %v147_v52, %v146_v50  ;;  %v154_v55 = vrot.slane %v153_v53, 2 }
 0x107   :  { %v149_v56 = vrot.slane %v148_v54, 1  ;;  %v155_v57 = vadd.f32 %v154_v55, %v153_v53 }
 0x109   :  { %v156_v58 = vrot.slane %v155_v57, 1  ;;  %v150_v59 = vadd.f32 %v149_v56, %v148_v54 }
 0x10b   :  { %v157_v60 = vadd.f32 %v156_v58, %v155_v57 }
 0x10d   :  { %v186_v61 = vcombine.low %v150_v59, %v157_v60 }
 0x10f   :  { %v193_v62 = vrot.slane %v186_v61, %v168_v33 }
 0x111   :  { %v200_v63 = vrot.slane %v193_v62, %v168_v33 }
 0x113   :  { %220 = vst.msk [vmem:[%s346_s3 + $0x1] ss:$8 sm:$0x3] %vm329_vm1, %v200_v63 }
 0x114   :  { %213 = vsyncpa [#allocation3], 1 }
 0x115   :  { %214 = vsyncpa [#allocation5], 1 }

// kernel: regressor_forward.5
= control target key start
LH: loop header
LB: loop body
LE: loop exit
PB: predicated region body
PF: predicated region fallthrough
CT: control target
= control target key end

     0   :  { %v27_v0 = vlaneseq  ;;  %vm133_vm0 = vcmask 7168   ;;  %s204_s0 = inlined_call_operand.vmem [shape: f32[16,512], index: 0, kind: input, shape index: {}]   ;;  %s205_s1 = inlined_call_operand.vmem [shape: f32[1,512], index: 1, kind: input, shape index: {}]   ;;  %s206_s2 = inlined_call_operand.vmem [shape: f32[1,512], index: 2, kind: input, shape index: {}]   ;;  %s207_s3 = inlined_call_operand.vmem [shape: f32[1,512], index: 3, kind: input, shape index: {}]   ;;  %s208_s4 = inlined_call_operand.vmem [shape: f32[16,1], index: 4, kind: output, shape index: {}]  }
   0x1   :  { %v17_v2 = vld [vmem:[%s204_s0] sm:$0xff]  ;;  %v18_v9 = vld [vmem:[%s204_s0 + $0x8] sm:$0xff]  ;;  %v19_v10 = vld [vmem:[%s204_s0 + $0x10] sm:$0xff] }
   0x2   :  { %v28_v1 = vshrl.u32 %v27_v0, 7  ;;  %v25_v3 = vld [vmem:[%s205_s1] sm:$0xf]  ;;  %v20_v11 = vld [vmem:[%s204_s0 + $0x18] sm:$0xff]  ;;  %v22_v26 = vld [vmem:[%s204_s0 + $0x28] sm:$0xff] }
   0x3   :  { %v55_v8 = vld [vmem:[%s206_s2] sm:$0xf]  ;;  %v23_v27 = vld [vmem:[%s204_s0 + $0x30] sm:$0xff]  ;;  %v24_v28 = vld [vmem:[%s204_s0 + $0x38] sm:$0xff] }
   0x4   :  { %v29_v4 = vsub.s32 0, %v28_v1  ;;  %v33_v5 = vsub.s32 1, %v28_v1  ;;  %v37_v6 = vsub.s32 2, %v28_v1  ;;  %v41_v7 = vsub.s32 3, %v28_v1  ;;  %v93_v16 = vld [vmem:[%s207_s3] sm:$0xf] }
   0x5   :  { %v21_v21 = vld [vmem:[%s204_s0 + $0x20] sm:$0xff] }
   0x6   :  { %v30_v12 = vrot.slane %v25_v3, %v29_v4  ;;  %v34_v13 = vrot.slane %v25_v3, %v33_v5  ;;  %v38_v14 = vrot.slane %v25_v3, %v37_v6  ;;  %v42_v15 = vrot.slane %v25_v3, %v41_v7 }
   0x7   :  { %v60_v17 = vrot.slane %v55_v8, %v29_v4  ;;  %v64_v18 = vrot.slane %v55_v8, %v33_v5  ;;  %v68_v19 = vrot.slane %v55_v8, %v37_v6  ;;  %v72_v20 = vrot.slane %v55_v8, %v41_v7 }
   0x8   :  { %v47_v22 = vmul.f32 %v30_v12, %v17_v2  ;;  %v48_v23 = vmul.f32 %v34_v13, %v18_v9  ;;  %v49_v24 = vmul.f32 %v38_v14, %v19_v10  ;;  %v50_v25 = vmul.f32 %v42_v15, %v20_v11 }
   0x9   :  { %v98_v29 = vrot.slane %v93_v16, %v29_v4  ;;  %v102_v30 = vrot.slane %v93_v16, %v33_v5  ;;  %v106_v31 = vrot.slane %v93_v16, %v37_v6  ;;  %v110_v32 = vrot.slane %v93_v16, %v41_v7 }
   0xa   :  { %v77_v33 = vadd.f32 %v60_v17, %v47_v22  ;;  %v78_v34 = vadd.f32 %v64_v18, %v48_v23  ;;  %v79_v35 = vadd.f32 %v68_v19, %v49_v24  ;;  %v80_v36 = vadd.f32 %v72_v20, %v50_v25 }
   0xb   :  { %v51_v37 = vmul.f32 %v30_v12, %v21_v21  ;;  %v52_v38 = vmul.f32 %v34_v13, %v22_v26  ;;  %v53_v39 = vmul.f32 %v38_v14, %v23_v27  ;;  %v54_v40 = vmul.f32 %v42_v15, %v24_v28 }
   0xc   :  { %v85_v41 = vmax.f32 %v77_v33, 0.0  ;;  %v86_v42 = vmax.f32 %v78_v34, 0.0  ;;  %v87_v43 = vmax.f32 %v79_v35, 0.0  ;;  %v88_v44 = vmax.f32 %v80_v36, 0.0 }
   0xd   :  { %v81_v45 = vadd.f32 %v60_v17, %v51_v37  ;;  %v82_v46 = vadd.f32 %v64_v18, %v52_v38  ;;  %v83_v47 = vadd.f32 %v68_v19, %v53_v39  ;;  %v84_v48 = vadd.f32 %v72_v20, %v54_v40 }
   0xe   :  { %v115_v49 = vmul.f32 %v98_v29, %v85_v41  ;;  %v116_v50 = vmul.f32 %v102_v30, %v86_v42  ;;  %v117_v51 = vmul.f32 %v106_v31, %v87_v43  ;;  %v118_v56 = vmul.f32 %v110_v32, %v88_v44 }
   0xf   :  { %v89_v52 = vmax.f32 %v81_v45, 0.0  ;;  %v90_v53 = vmax.f32 %v82_v46, 0.0  ;;  %v91_v54 = vmax.f32 %v83_v47, 0.0  ;;  %v92_v55 = vmax.f32 %v84_v48, 0.0 }
  0x10   :  { %v123_v57 = vadd.f32 %v116_v50, %v115_v49 }
  0x11   :  { %v119_v58 = vmul.f32 %v98_v29, %v89_v52  ;;  %v120_v59 = vmul.f32 %v102_v30, %v90_v53  ;;  %v121_v60 = vmul.f32 %v106_v31, %v91_v54  ;;  %v122_v62 = vmul.f32 %v110_v32, %v92_v55 }
  0x12   :  { %v124_v61 = vadd.f32 %v123_v57, %v117_v51 }
  0x13   :  { %v128_v63 = vadd.f32 %v120_v59, %v119_v58 }
  0x14   :  { %v125_v0 = vadd.f32 %v124_v61, %v118_v56 }
  0x15   :  { %v129_v1 = vadd.f32 %v128_v63, %v121_v60 }
  0x16   :  { %126 = vadd.xlane.f32.xlu0 %v125_v0 }
  0x17   :  { %v130_v2 = vadd.f32 %v129_v1, %v122_v62 }
  0x1a   :  { %131 = vadd.xlane.f32.xlu0 %v130_v2 }
  0x9f   :  { %v127_v3 = vpop.xlane.xlu0 %126 }
  0xa0   :  { %134 = vst.msk [vmem:[%s208_s4] sm:$0xff] %vm133_vm0, %v127_v3 }
  0xa3   :  { %v132_v4 = vpop.xlane.xlu0 %131 }
  0xa4   :  { %135 = vst.msk [vmem:[%s208_s4 + $0x8] sm:$0xff] %vm133_vm0, %v132_v4 }

// kernel: regressor_forward.4
= control target key start
LH: loop header
LB: loop body
LE: loop exit
PB: predicated region body
PF: predicated region fallthrough
CT: control target
= control target key end

     0   :  { %11 = vsyncpa [#allocation3], 0  ;;  %s897_s18 = smov [#allocation2]   ;;  %s1010_s0 = inlined_call_operand.vmem [shape: f32[16,256], index: 0, kind: input, shape index: {}]   ;;  %s1011_s1 = inlined_call_operand.vmem [shape: f32[1,256], index: 1, kind: input, shape index: {}]   ;;  %s1012_s2 = inlined_call_operand.vmem [shape: f32[1,256], index: 2, kind: input, shape index: {}]   ;;  %s1013_s3 = inlined_call_operand.hbm [shape: bf16[256,512], index: 3, kind: input, shape index: {}]   ;;  %s1014_s4 = inlined_call_operand.vmem [shape: f32[16,512], index: 4, kind: output, shape index: {0}]   ;;  %s1015_s5 = inlined_call_operand.vmem [shape: f32[1,8,512], index: 5, kind: output, shape index: {1}]  }
   0x1   :  { %s23_s19 = sshll.u32 %s897_s18, 4  ;;  %s24_s19 = int_to_ptr.vmem [resolvable:$true] %s23_s19 }
   0x2   :  { %s883_s20 = scalar_lea.vmem %s24_s19, 8192  ;;  %p888_p1 = scmp.lt.s32.totalorder %s24_s19, %s24_s19 }
   0x3   :  { %p884_p0 = scmp.ne.s32.totalorder %s24_s19, %s883_s20  ;;  %p889_p2 = scmp.lt.s32.totalorder %s883_s20, %s883_s20 }
   0x5   :  { %p890_p3 = por %p889_p2, %p888_p1 }
   0x7   :  { %p891_p4 = pnand %p890_p3, %p884_p0 }
   0x9   :  { %894 = shalt.err (!%p891_p4)
}
   0xa   :  { %s898_s21 = smov 256   ;;  %s899_s22 = smov 16  }
   0xb   :  { %29 = dma.hbm_to_vmem [thread:$0]  %s1013_s3, 8192, %s24_s19, [#allocation3], %s898_s21, %s898_s21, %s899_s22  }
   0xc   :  { %895 = dma.done.wait [#allocation3], 8192  }
   0xd   :  { %896 = vsyncadd [#allocation3], 4294959104  ;;  %v779_v0 = vld [vmem:[#allocation2 + $0xe4] ss:$16 sps:$4 sm:$0xff]   ;;  %v781_v1 = vld [vmem:[#allocation2 + $0xec] ss:$16 sps:$4 sm:$0xff]   ;;  %v39_v37 = vlaneseq }
   0xe   :  { %459 = vmatprep.subr.bf16.mxu0 %v779_v0  ;;  %v783_v2 = vld [vmem:[#allocation2 + $0xe0] ss:$16 sps:$4 sm:$0xff]   ;;  %v784_v3 = vld [vmem:[#allocation2 + $0xe8] ss:$16 sps:$4 sm:$0xff]   ;;  %502 = vmatprep.subr.bf16.mxu1 %v781_v1  ;;  %v785_v4 = vld [vmem:[#allocation2 + $0xc4] ss:$16 sps:$4 sm:$0xff]  }
   0xf   :  { %460 = vmatpush1.bf16.msra.mxu0 %v783_v2  ;;  %503 = vmatpush1.bf16.msra.mxu1 %v784_v3  ;;  %v787_v5 = vld [vmem:[#allocation2 + $0xcc] ss:$16 sps:$4 sm:$0xff]   ;;  %v789_v6 = vld [vmem:[#allocation2 + $0xc0] ss:$16 sps:$4 sm:$0xff]   ;;  %v790_v7 = vld [vmem:[#allocation2 + $0xc8] ss:$16 sps:$4 sm:$0xff]  }
  0x10   :  { %461 = vmatprep.subr.bf16.mxu0 %v785_v4  ;;  %504 = vmatprep.subr.bf16.mxu1 %v787_v5  ;;  %v791_v8 = vld [vmem:[#allocation2 + $0xa4] ss:$16 sps:$4 sm:$0xff]   ;;  %v793_v9 = vld [vmem:[#allocation2 + $0xac] ss:$16 sps:$4 sm:$0xff]   ;;  %v795_v10 = vld [vmem:[#allocation2 + $0xa0] ss:$16 sps:$4 sm:$0xff]  }
  0x11   :  { %v796_v11 = vld [vmem:[#allocation2 + $0xa8] ss:$16 sps:$4 sm:$0xff]   ;;  %v797_v12 = vld [vmem:[#allocation2 + $0x84] ss:$16 sps:$4 sm:$0xff]   ;;  %v799_v13 = vld [vmem:[#allocation2 + $0x8c] ss:$16 sps:$4 sm:$0xff]  }
  0x12   :  { %v801_v14 = vld [vmem:[#allocation2 + $0x80] ss:$16 sps:$4 sm:$0xff]   ;;  %v802_v15 = vld [vmem:[#allocation2 + $0x88] ss:$16 sps:$4 sm:$0xff]   ;;  %v803_v16 = vld [vmem:[#allocation2 + $0x64] ss:$16 sps:$4 sm:$0xff]  }
  0x13   :  { %462 = vmatpush1.bf16.msra.mxu0 %v789_v6  ;;  %505 = vmatpush1.bf16.msra.mxu1 %v790_v7  ;;  %v805_v17 = vld [vmem:[#allocation2 + $0x6c] ss:$16 sps:$4 sm:$0xff]   ;;  %v807_v18 = vld [vmem:[#allocation2 + $0x60] ss:$16 sps:$4 sm:$0xff]   ;;  %v808_v19 = vld [vmem:[#allocation2 + $0x68] ss:$16 sps:$4 sm:$0xff]  }
  0x14   :  { %463 = vmatprep.subr.bf16.mxu0 %v791_v8  ;;  %506 = vmatprep.subr.bf16.mxu1 %v793_v9  ;;  %v809_v20 = vld [vmem:[#allocation2 + $0x44] ss:$16 sps:$4 sm:$0xff]   ;;  %v811_v21 = vld [vmem:[#allocation2 + $0x4c] ss:$16 sps:$4 sm:$0xff]   ;;  %v813_v22 = vld [vmem:[#allocation2 + $0x40] ss:$16 sps:$4 sm:$0xff]  }
  0x15   :  { %v814_v23 = vld [vmem:[#allocation2 + $0x48] ss:$16 sps:$4 sm:$0xff]   ;;  %v815_v24 = vld [vmem:[#allocation2 + $0x24] ss:$16 sps:$4 sm:$0xff]   ;;  %v817_v25 = vld [vmem:[#allocation2 + $0x2c] ss:$16 sps:$4 sm:$0xff]  }
  0x16   :  { %v819_v26 = vld [vmem:[#allocation2 + $0x20] ss:$16 sps:$4 sm:$0xff]   ;;  %v820_v27 = vld [vmem:[#allocation2 + $0x28] ss:$16 sps:$4 sm:$0xff]   ;;  %v821_v28 = vld [vmem:[#allocation2 + $0x4] ss:$16 sps:$4 sm:$0xff]  }
  0x17   :  { %464 = vmatpush1.bf16.msra.mxu0 %v795_v10  ;;  %507 = vmatpush1.bf16.msra.mxu1 %v796_v11  ;;  %v823_v29 = vld [vmem:[#allocation2 + $0xc] ss:$16 sps:$4 sm:$0xff]   ;;  %v825_v30 = vld [vmem:[#allocation2] ss:$16 sps:$4 sm:$0xff]   ;;  %v826_v31 = vld [vmem:[#allocation2 + $0x8] ss:$16 sps:$4 sm:$0xff]  }
  0x18   :  { %465 = vmatprep.subr.bf16.mxu0 %v797_v12  ;;  %508 = vmatprep.subr.bf16.mxu1 %v799_v13  ;;  %v827_v32 = vld [vmem:[#allocation2 + $0x1e4] ss:$16 sps:$4 sm:$0xff]   ;;  %v829_v33 = vld [vmem:[#allocation2 + $0x1ec] ss:$16 sps:$4 sm:$0xff]   ;;  %v831_v34 = vld [vmem:[#allocation2 + $0x1e0] ss:$16 sps:$4 sm:$0xff]  }
  0x19   :  { %v832_v35 = vld [vmem:[#allocation2 + $0x1e8] ss:$16 sps:$4 sm:$0xff]   ;;  %v833_v36 = vld [vmem:[#allocation2 + $0x1c4] ss:$16 sps:$4 sm:$0xff]   ;;  %v835_v38 = vld [vmem:[#allocation2 + $0x1cc] ss:$16 sps:$4 sm:$0xff]  }
  0x1a   :  { %v837_v39 = vld [vmem:[#allocation2 + $0x1c0] ss:$16 sps:$4 sm:$0xff]   ;;  %v838_v40 = vld [vmem:[#allocation2 + $0x1c8] ss:$16 sps:$4 sm:$0xff]   ;;  %v839_v41 = vld [vmem:[#allocation2 + $0x1a4] ss:$16 sps:$4 sm:$0xff]  }
  0x1b   :  { %466 = vmatpush1.bf16.msra.mxu0 %v801_v14  ;;  %509 = vmatpush1.bf16.msra.mxu1 %v802_v15  ;;  %v936_v42 = vshrl.u32 %v39_v37, 7  ;;  %v841_v43 = vld [vmem:[#allocation2 + $0x1ac] ss:$16 sps:$4 sm:$0xff]   ;;  %v843_v44 = vld [vmem:[#allocation2 + $0x1a0] ss:$16 sps:$4 sm:$0xff]   ;;  %vm996_vm0 = vcmp.lt.s32.totalorder %v39_v37, 512 }
  0x1c   :  { %467 = vmatprep.subr.bf16.mxu0 %v803_v16  ;;  %510 = vmatprep.subr.bf16.mxu1 %v805_v17  ;;  %v844_v45 = vld [vmem:[#allocation2 + $0x1a8] ss:$16 sps:$4 sm:$0xff]   ;;  %v845_v46 = vld [vmem:[#allocation2 + $0x184] ss:$16 sps:$4 sm:$0xff]   ;;  %v847_v48 = vld [vmem:[#allocation2 + $0x18c] ss:$16 sps:$4 sm:$0xff]  }
  0x1d   :  { %v45_v47 = vsub.s32 1, %v936_v42  ;;  %v34_v49 = vld [vmem:[%s1010_s0 + $0x8] sm:$0xff]  ;;  %v36_v50 = vld [vmem:[%s1010_s0 + $0x18] sm:$0xff]  ;;  %v37_v51 = vld [vmem:[%s1011_s1] sm:$0x3]  ;;  %v41_v52 = vsub.s32 0, %v936_v42 }
  0x1e   :  { %v53_v53 = vld [vmem:[%s1012_s2] sm:$0x3]  ;;  %v850_v55 = vld [vmem:[#allocation2 + $0x188] ss:$16 sps:$4 sm:$0xff]   ;;  %v851_v57 = vld [vmem:[#allocation2 + $0x164] ss:$16 sps:$4 sm:$0xff]  }
  0x1f   :  { %468 = vmatpush1.bf16.msra.mxu0 %v807_v18  ;;  %511 = vmatpush1.bf16.msra.mxu1 %v808_v19  ;;  %v849_v54 = vld [vmem:[#allocation2 + $0x180] ss:$16 sps:$4 sm:$0xff]   ;;  %v46_v56 = vrot.slane %v37_v51, %v45_v47  ;;  %v853_v58 = vld [vmem:[#allocation2 + $0x16c] ss:$16 sps:$4 sm:$0xff]   ;;  %v62_v59 = vrot.slane %v53_v53, %v45_v47  ;;  %v42_v63 = vrot.slane %v37_v51, %v41_v52  ;;  %v856_v0 = vld [vmem:[#allocation2 + $0x168] ss:$16 sps:$4 sm:$0xff]  }
  0x20   :  { %469 = vmatprep.subr.bf16.mxu0 %v809_v20  ;;  %512 = vmatprep.subr.bf16.mxu1 %v811_v21  ;;  %v855_v62 = vld [vmem:[#allocation2 + $0x160] ss:$16 sps:$4 sm:$0xff]   ;;  %v857_v5 = vld [vmem:[#allocation2 + $0x144] ss:$16 sps:$4 sm:$0xff]   ;;  %v859_v6 = vld [vmem:[#allocation2 + $0x14c] ss:$16 sps:$4 sm:$0xff]   ;;  %v58_v9 = vrot.slane %v53_v53, %v41_v52 }
  0x21   :  { %v50_v60 = vmul.f32 %v46_v56, %v34_v49  ;;  %v52_v61 = vmul.f32 %v46_v56, %v36_v50  ;;  %v33_v3 = vld [vmem:[%s1010_s0] sm:$0xff]  ;;  %v35_v4 = vld [vmem:[%s1010_s0 + $0x10] sm:$0xff]  ;;  %v862_v13 = vld [vmem:[#allocation2 + $0x148] ss:$16 sps:$4 sm:$0xff]   ;;  %v901_v53 = vmov 1966171168  }
  0x22   :  { %v49_v10 = vmul.f32 %v42_v63, %v33_v3  ;;  %v51_v11 = vmul.f32 %v42_v63, %v35_v4  ;;  %v861_v12 = vld [vmem:[#allocation2 + $0x140] ss:$16 sps:$4 sm:$0xff]   ;;  %v863_v15 = vld [vmem:[#allocation2 + $0x124] ss:$16 sps:$4 sm:$0xff]   ;;  %v865_v16 = vld [vmem:[#allocation2 + $0x12c] ss:$16 sps:$4 sm:$0xff]  }
  0x23   :  { %470 = vmatpush1.bf16.msra.mxu0 %v813_v22  ;;  %513 = vmatpush1.bf16.msra.mxu1 %v814_v23  ;;  %v66_v1 = vadd.f32 %v62_v59, %v50_v60  ;;  %v68_v2 = vadd.f32 %v62_v59, %v52_v61  ;;  %v867_v19 = vld [vmem:[#allocation2 + $0x120] ss:$16 sps:$4 sm:$0xff]   ;;  %v868_v20 = vld [vmem:[#allocation2 + $0x128] ss:$16 sps:$4 sm:$0xff]   ;;  %v869_v21 = vld [vmem:[#allocation2 + $0x104] ss:$16 sps:$4 sm:$0xff]  }
  0x24   :  { %471 = vmatprep.subr.bf16.mxu0 %v815_v24  ;;  %514 = vmatprep.subr.bf16.mxu1 %v817_v25  ;;  %v65_v17 = vadd.f32 %v58_v9, %v49_v10  ;;  %v67_v18 = vadd.f32 %v58_v9, %v51_v11  ;;  %v871_v22 = vld [vmem:[#allocation2 + $0x10c] ss:$16 sps:$4 sm:$0xff]   ;;  %v873_v25 = vld [vmem:[#allocation2 + $0x100] ss:$16 sps:$4 sm:$0xff]  }
  0x25   :  { %v70_v7 = vmax.f32 %v66_v1, 0.0  ;;  %v72_v8 = vmax.f32 %v68_v2, 0.0 }
  0x26   :  { %v69_v23 = vmax.f32 %v65_v17, 0.0  ;;  %v71_v24 = vmax.f32 %v67_v18, 0.0 }
  0x27   :  { %472 = vmatpush1.bf16.msra.mxu0 %v819_v26  ;;  %515 = vmatpush1.bf16.msra.mxu1 %v820_v27  ;;  %v74_v14 = vpack.c.bf16 %v72_v8, %v70_v7  ;;  %v874_v26 = vld [vmem:[#allocation2 + $0x108] ss:$16 sps:$4 sm:$0xff]  }
  0x28   :  { %473 = vmatprep.subr.bf16.mxu0 %v821_v28  ;;  %516 = vmatprep.subr.bf16.mxu1 %v823_v29  ;;  %v73_v27 = vpack.c.bf16 %v71_v24, %v69_v23  ;;  %v900_v28 = vmov 0.0  }
  0x29   :  { %491 = vmatprep.mubr.bf16.mxu0 %v74_v14  ;;  %534 = vmatprep.mubr.bf16.mxu1 %v74_v14  ;;  %629 = vst [vmem:[%s1015_s5] sm:$0xff] %v900_v28  ;;  %630 = vst [vmem:[%s1015_s5 + $0x8] sm:$0xff] %v900_v28 }
  0x2a   :  { %631 = vst [vmem:[%s1015_s5 + $0x10] sm:$0xff] %v900_v28  ;;  %632 = vst [vmem:[%s1015_s5 + $0x18] sm:$0xff] %v900_v28 }
  0x2b   :  { %474 = vmatpush1.bf16.msra.mxu0 %v825_v30  ;;  %517 = vmatpush1.bf16.msra.mxu1 %v826_v31 }
  0x2c   :  { %475 = vmatprep.subr.bf16.mxu0 %v827_v32  ;;  %518 = vmatprep.subr.bf16.mxu1 %v829_v33 }
  0x2f   :  { %476 = vmatpush2.bf16.msra.mxu0 %v831_v34  ;;  %519 = vmatpush2.bf16.msra.mxu1 %v832_v35 }
  0x30   :  { %477 = vmatprep.subr.bf16.mxu0 %v833_v36  ;;  %520 = vmatprep.subr.bf16.mxu1 %v835_v38 }
  0x33   :  { %478 = vmatpush2.bf16.msra.mxu0 %v837_v39  ;;  %521 = vmatpush2.bf16.msra.mxu1 %v838_v40 }
  0x34   :  { %479 = vmatprep.subr.bf16.mxu0 %v839_v41  ;;  %522 = vmatprep.subr.bf16.mxu1 %v841_v43 }
  0x37   :  { %480 = vmatpush2.bf16.msra.mxu0 %v843_v44  ;;  %523 = vmatpush2.bf16.msra.mxu1 %v844_v45 }
  0x38   :  { %481 = vmatprep.subr.bf16.mxu0 %v845_v46  ;;  %524 = vmatprep.subr.bf16.mxu1 %v847_v48 }
  0x3b   :  { %482 = vmatpush2.bf16.msra.mxu0 %v849_v54  ;;  %525 = vmatpush2.bf16.msra.mxu1 %v850_v55  ;;  %v640_v54 = vunpack.c.l.s4 %v901_v53 }
  0x3c   :  { %483 = vmatprep.subr.bf16.mxu0 %v851_v57  ;;  %526 = vmatprep.subr.bf16.mxu1 %v853_v58 }
  0x3d   :  { %v641_v63 = vunpack.c.0.s8 %v640_v54 }
  0x3f   :  { %484 = vmatpush2.bf16.msra.mxu0 %v855_v62  ;;  %527 = vmatpush2.bf16.msra.mxu1 %v856_v0  ;;  %v644_v8 = vsub.s32 %v641_v63, %v936_v42 }
  0x40   :  { %485 = vmatprep.subr.bf16.mxu0 %v857_v5  ;;  %528 = vmatprep.subr.bf16.mxu1 %v859_v6 }
  0x43   :  { %486 = vmatpush2.bf16.msra.mxu0 %v861_v12  ;;  %529 = vmatpush2.bf16.msra.mxu1 %v862_v13 }
  0x44   :  { %487 = vmatprep.subr.bf16.mxu0 %v863_v15  ;;  %530 = vmatprep.subr.bf16.mxu1 %v865_v16 }
  0x47   :  { %488 = vmatpush2.bf16.msra.mxu0 %v867_v19  ;;  %531 = vmatpush2.bf16.msra.mxu1 %v868_v20 }
  0x48   :  { %489 = vmatprep.subr.bf16.mxu0 %v869_v21  ;;  %532 = vmatprep.subr.bf16.mxu1 %v871_v22 }
  0x4b   :  { %490 = vmatpush2.bf16.msra.mxu0 %v873_v25  ;;  %533 = vmatpush2.bf16.msra.mxu1 %v874_v26 }
  0x4e   :  { %492 = vmatmul.mubr.bf16.vlgmr.msra.gmra.mxu0 %v73_v27  ;;  %535 = vmatmul.mubr.bf16.vlgmr.msra.gmra.mxu1 %v73_v27 }
 0x10e   :  { %v493_v29 = vpop.f32.mrf.mxu0  ;;  %v536_v30 = vpop.f32.mrf.mxu1 }
 0x10f   :  { %545 = vst [vmem:[%s1014_s4] sm:$0xff] %v493_v29  ;;  %547 = vst [vmem:[%s1014_s4 + $0x10] sm:$0xff] %v536_v30 }
 0x110   :  { %v495_v31 = vpop.f32.mrf.mxu0  ;;  %v538_v32 = vpop.f32.mrf.mxu1 }
 0x111   :  { %546 = vst [vmem:[%s1014_s4 + $0x8] sm:$0xff] %v495_v31  ;;  %548 = vst [vmem:[%s1014_s4 + $0x18] sm:$0xff] %v538_v32 }
 0x112   :  { %v497_v33 = vpop.f32.mrf.mxu0  ;;  %v540_v34 = vpop.f32.mrf.mxu1 }
 0x113   :  { %549 = vst [vmem:[%s1014_s4 + $0x20] sm:$0xff] %v497_v33  ;;  %v553_v35 = vadd.f32 %v497_v33, %v493_v29  ;;  %551 = vst [vmem:[%s1014_s4 + $0x30] sm:$0xff] %v540_v34  ;;  %v567_v36 = vadd.f32 %v540_v34, %v536_v30 }
 0x114   :  { %v499_v38 = vpop.f32.mrf.mxu0  ;;  %v542_v39 = vpop.f32.mrf.mxu1 }
 0x115   :  { %v554_v40 = vrot.slane %v553_v35, 4  ;;  %v568_v41 = vrot.slane %v567_v36, 4  ;;  %550 = vst [vmem:[%s1014_s4 + $0x28] sm:$0xff] %v499_v38  ;;  %v560_v43 = vadd.f32 %v499_v38, %v495_v31  ;;  %552 = vst [vmem:[%s1014_s4 + $0x38] sm:$0xff] %v542_v39  ;;  %v574_v44 = vadd.f32 %v542_v39, %v538_v32 }
 0x117   :  { %v555_v45 = vadd.f32 %v554_v40, %v553_v35  ;;  %v569_v46 = vadd.f32 %v568_v41, %v567_v36  ;;  %v561_v47 = vrot.slane %v560_v43, 4  ;;  %v575_v48 = vrot.slane %v574_v44, 4 }
 0x119   :  { %v556_v49 = vrot.slane %v555_v45, 2  ;;  %v570_v50 = vrot.slane %v569_v46, 2  ;;  %v562_v51 = vadd.f32 %v561_v47, %v560_v43  ;;  %v576_v52 = vadd.f32 %v575_v48, %v574_v44 }
 0x11b   :  { %v557_v55 = vadd.f32 %v556_v49, %v555_v45  ;;  %v571_v56 = vadd.f32 %v570_v50, %v569_v46  ;;  %v563_v57 = vrot.slane %v562_v51, 2  ;;  %v577_v58 = vrot.slane %v576_v52, 2 }
 0x11d   :  { %v558_v59 = vrot.slane %v557_v55, 1  ;;  %v572_v60 = vrot.slane %v571_v56, 1  ;;  %v564_v61 = vadd.f32 %v563_v57, %v562_v51  ;;  %v578_v62 = vadd.f32 %v577_v58, %v576_v52 }
 0x11f   :  { %v559_v0 = vadd.f32 %v558_v59, %v557_v55  ;;  %v573_v1 = vadd.f32 %v572_v60, %v571_v56  ;;  %v565_v2 = vrot.slane %v564_v61, 1  ;;  %v579_v3 = vrot.slane %v578_v62, 1 }
 0x121   :  { %v581_v4 = vmul.f32 0.0625, %v559_v0  ;;  %v583_v5 = vmul.f32 0.0625, %v573_v1  ;;  %v566_v6 = vadd.f32 %v565_v2, %v564_v61  ;;  %v580_v7 = vadd.f32 %v579_v3, %v578_v62 }
 0x123   :  { %v585_v9 = vsub.f32 %v493_v29, %v581_v4  ;;  %v589_v10 = vsub.f32 %v497_v33, %v581_v4  ;;  %v587_v11 = vsub.f32 %v536_v30, %v583_v5  ;;  %v591_v12 = vsub.f32 %v540_v34, %v583_v5 }
 0x124   :  { %v582_v13 = vmul.f32 0.0625, %v566_v6  ;;  %v637_v14 = vcombine.low %v559_v0, %v566_v6  ;;  %v584_v15 = vmul.f32 0.0625, %v580_v7  ;;  %v638_v16 = vcombine.low %v573_v1, %v580_v7 }
 0x125   :  { %v593_v17 = vmul.f32 %v585_v9, %v585_v9  ;;  %v597_v18 = vmul.f32 %v589_v10, %v589_v10  ;;  %v595_v19 = vmul.f32 %v587_v11, %v587_v11  ;;  %v599_v20 = vmul.f32 %v591_v12, %v591_v12 }
 0x126   :  { %v586_v21 = vsub.f32 %v495_v31, %v582_v13  ;;  %v590_v22 = vsub.f32 %v499_v38, %v582_v13  ;;  %v645_v23 = vrot.slane %v637_v14, %v644_v8  ;;  %v588_v24 = vsub.f32 %v538_v32, %v584_v15 }
 0x127   :  { %v601_v25 = vadd.f32 %v597_v18, %v593_v17  ;;  %v615_v26 = vadd.f32 %v599_v20, %v595_v19  ;;  %v592_v27 = vsub.f32 %v542_v39, %v584_v15  ;;  %v652_v42 = vrot.slane %v638_v16, %v644_v8 }
 0x128   :  { %v594_v28 = vmul.f32 %v586_v21, %v586_v21  ;;  %v598_v29 = vmul.f32 %v590_v22, %v590_v22  ;;  %v596_v30 = vmul.f32 %v588_v24, %v588_v24 }
 0x129   :  { %v602_v33 = vrot.slane %v601_v25, 4  ;;  %v616_v34 = vrot.slane %v615_v26, 4  ;;  %v600_v35 = vmul.f32 %v592_v27, %v592_v27  ;;  %v653_v36 = vcombine.low %v645_v23, %v652_v42 }
 0x12a   :  { %v608_v31 = vadd.f32 %v598_v29, %v594_v28 }
 0x12b   :  { %v603_v38 = vadd.f32 %v602_v33, %v601_v25  ;;  %v617_v41 = vadd.f32 %v616_v34, %v615_v26  ;;  %v622_v32 = vadd.f32 %v600_v35, %v596_v30  ;;  %v660_v43 = vrot.slane %v653_v36, %v644_v8 }
 0x12c   :  { %v609_v44 = vrot.slane %v608_v31, 4 }
 0x12d   :  { %v604_v39 = vrot.slane %v603_v38, 2  ;;  %v618_v45 = vrot.slane %v617_v41, 2  ;;  %v623_v46 = vrot.slane %v622_v32, 4  ;;  %666 = vst.msk [vmem:[%s1015_s5] ss:$8 sm:$0xf] %vm996_vm0, %v660_v43 }
 0x12e   :  { %v610_v47 = vadd.f32 %v609_v44, %v608_v31 }
 0x12f   :  { %v605_v37 = vadd.f32 %v604_v39, %v603_v38  ;;  %v619_v48 = vadd.f32 %v618_v45, %v617_v41  ;;  %v624_v49 = vadd.f32 %v623_v46, %v622_v32 }
 0x130   :  { %v611_v50 = vrot.slane %v610_v47, 2 }
 0x131   :  { %v625_v51 = vrot.slane %v624_v49, 2  ;;  %v606_v52 = vrot.slane %v605_v37, 1  ;;  %v620_v54 = vrot.slane %v619_v48, 1 }
 0x132   :  { %v612_v53 = vadd.f32 %v611_v50, %v610_v47 }
 0x133   :  { %v626_v55 = vadd.f32 %v625_v51, %v624_v49  ;;  %v607_v58 = vadd.f32 %v606_v52, %v605_v37  ;;  %v621_v60 = vadd.f32 %v620_v54, %v619_v48 }
 0x134   :  { %v613_v56 = vrot.slane %v612_v53, 1 }
 0x135   :  { %v627_v57 = vrot.slane %v626_v55, 1 }
 0x136   :  { %v614_v59 = vadd.f32 %v613_v56, %v612_v53 }
 0x137   :  { %v628_v61 = vadd.f32 %v627_v57, %v626_v55 }
 0x138   :  { %v672_v62 = vcombine.low %v607_v58, %v614_v59 }
 0x139   :  { %v673_v63 = vcombine.low %v621_v60, %v628_v61 }
 0x13a   :  { %v680_v0 = vrot.slane %v672_v62, %v644_v8 }
 0x13b   :  { %v687_v1 = vrot.slane %v673_v63, %v644_v8 }
 0x13d   :  { %v688_v2 = vcombine.low %v680_v0, %v687_v1 }
 0x13f   :  { %v695_v3 = vrot.slane %v688_v2, %v644_v8 }
 0x141   :  { %773 = vst.msk [vmem:[%s1015_s5 + $0x1] ss:$8 sm:$0xf] %vm996_vm0, %v695_v3 }
 0x142   :  { %708 = vsyncpa [#allocation3], 1 }

</bundles_post_ra>
